<compile_context>
chip_gen: v6e
topology: v6e:2x2x1
jax: 0.10.0
libtpu: 0.0.40
codegen_flags: <defaults>
</compile_context>

<pallas_src>
import functools

import jax
import jax.numpy as jnp
from jax.experimental import pallas as pl
from jax.experimental.pallas import tpu as pltpu


def _cdiv(a, b):
    return -(-a // b)


def _round_up(v, m):
    return _cdiv(v, m) * m


def _is_v7x():
    """Best-effort TPU generation detection (never raises)."""
    try:
        kind = jax.local_devices()[0].device_kind.lower()
    except Exception:
        return False
    return ("v7" in kind) or ("7x" in kind)


def _int_pow(x, n):
    """x ** n for a static non-negative integer n via repeated squaring (VPU only)."""
    if n == 0:
        return jnp.ones_like(x)
    result = None
    base = x
    while n > 0:
        if n & 1:
            result = base if result is None else result * base
        n >>= 1
        if n:
            base = base * base
    return result


def _asl_kernel(x_ref, y_ref, out_ref, acc_ref, *,
                gamma_neg, gamma_pos, clip, eps,
                blocks_total, blocks_per_par, block_rows, rows_in_last,
                fast_path, needs_row_mask, has_padded_blocks):
    i = pl.program_id(0)
    j = pl.program_id(1)

    # Zero this core's elementwise accumulator at the start of each sweep.
    @pl.when(j == 0)
    def _():
        acc_ref[...] = jnp.zeros_like(acc_ref)

    x = x_ref[...].astype(jnp.float32)
    y = y_ref[...].astype(jnp.float32)

    # 1-EUP sigmoid: sigmoid(x) = 0.5 * tanh(x / 2) + 0.5
    t = jnp.tanh(x * 0.5)
    xs_pos = 0.5 * t + 0.5
    xs_neg = 0.5 - 0.5 * t
    if clip is not None and clip > 0:
        xs_neg = jnp.minimum(xs_neg + clip, 1.0)

    if fast_path:
        # Valid for hard {0,1} targets and non-negative integer gammas:
        #   y*log(max(xs_pos,eps)) + (1-y)*log(max(xs_neg,eps)) == log(max(pt,eps))
        #   (1-pt)**(gp*y + gn*(1-y)) == where(y, (1-pt)**gp, (1-pt)**gn)
        pt = xs_pos * y + xs_neg * (1.0 - y)
        loss = jnp.log(jnp.maximum(pt, eps))
        if gamma_neg > 0 or gamma_pos > 0:
            one_minus_pt = 1.0 - pt
            w_pos = _int_pow(one_minus_pt, int(gamma_pos))
            w_neg = _int_pow(one_minus_pt, int(gamma_neg))
            loss = loss * jnp.where(y > 0.5, w_pos, w_neg)
    else:
        # General path (soft labels / non-integer gammas), mirrors torch exactly.
        los_pos = y * jnp.log(jnp.maximum(xs_pos, eps))
        los_neg = (1.0 - y) * jnp.log(jnp.maximum(xs_neg, eps))
        loss = los_pos + los_neg
        if gamma_neg > 0 or gamma_pos > 0:
            pt = xs_pos * y + xs_neg * (1.0 - y)
            one_sided_gamma = gamma_pos * y + gamma_neg * (1.0 - y)
            loss = loss * jnp.power(1.0 - pt, one_sided_gamma)

    n_cols = loss.shape[-1]

    def _row_reduce(v):
        # (block_rows, C) -> (8, C): pure-VPU adds across sublane groups
        # (reduce axis is the leading vreg-group axis, not the lane axis).
        return v.reshape(block_rows // 8, 8, n_cols).sum(axis=0)

    block_idx = i * blocks_per_par + j

    if needs_row_mask:
        # Full blocks: plain accumulate (no mask on the hot path).
        @pl.when(block_idx < blocks_total - 1)
        def _():
            acc_ref[...] += _row_reduce(loss)

        # The single ragged block: mask rows past the end of the batch
        # (select, not multiply, so stale NaNs cannot propagate).
        @pl.when(block_idx == blocks_total - 1)
        def _():
            rows = jax.lax.broadcasted_iota(jnp.int32, loss.shape, 0)
            acc_ref[...] += _row_reduce(jnp.where(rows < rows_in_last, loss, 0.0))
        # Padding blocks (block_idx >= blocks_total, clamped index_map): skipped.
    elif has_padded_blocks:
        @pl.when(block_idx < blocks_total)
        def _():
            acc_ref[...] += _row_reduce(loss)
    else:
        acc_ref[...] += _row_reduce(loss)

    @pl.when(j == pl.num_programs(1) - 1)
    def _():
        partial = jnp.sum(acc_ref[...])   # single XLU reduce per core, in the epilogue
        # Lane-dense (8, 128) output block, filled with this core's partial sum.
        out_ref[...] = jnp.full(out_ref.shape, partial, dtype=out_ref.dtype)


def asymmetric_loss(x, y, *, gamma_neg=4, gamma_pos=1, clip=0.05, eps=1e-8,
                    assume_binary_targets=False, num_parallel=None,
                    block_rows=None, vmem_budget_bytes=None):
    """Pallas implementation of AsymmetricLoss.forward(x, y) -> scalar."""
    assert x.shape == y.shape and x.ndim == 2
    B, C = x.shape

    is_v7x = _is_v7x()
    if num_parallel is None:
        num_parallel = 2 if is_v7x else 1     # v7x: 2 TCs/chip; v5e/v6e: 1 TC
    if vmem_budget_bytes is None:
        # v7x has 64 MiB VMEM/TC; v5e/v6e have 128 MiB -> spend it on row tiles.
        vmem_budget_bytes = (16 if is_v7x else 48) * 1024 * 1024

    itemsize_x = jnp.dtype(x.dtype).itemsize
    itemsize_y = jnp.dtype(y.dtype).itemsize
    # Minimum sublane tile depends on the narrowest input dtype (f32:8, bf16:16, i8:32).
    min_rows = max(8, 32 // min(itemsize_x, itemsize_y))
    C_pad = _round_up(C, 128)   # physical lane footprint (VMEM estimates only)

    # Per-row VMEM cost: 2 pipeline buffers of (x + y) + ~6 live f32 temporaries.
    bytes_per_row = C_pad * (2 * (itemsize_x + itemsize_y) + 6 * 4)
    if block_rows is None:
        block_rows = (vmem_budget_bytes // bytes_per_row) // min_rows * min_rows
        block_rows = min(max(block_rows, min_rows), 2048 if is_v7x else 4096)
    block_rows = min(int(block_rows), _round_up(B, min_rows))
    block_rows = _round_up(max(block_rows, min_rows), min_rows)

    blocks_total = _cdiv(B, block_rows)
    n_par = max(1, min(int(num_parallel), blocks_total))
    blocks_per_par = _cdiv(blocks_total, n_par)

    rows_in_last = B - (blocks_total - 1) * block_rows
    needs_row_mask = rows_in_last != block_rows
    has_padded_blocks = n_par * blocks_per_par > blocks_total

    # Fast path only when targets are verifiably hard {0,1} (bool/int dtype) or
    # the caller explicitly asserts binary targets; gammas must be non-neg ints.
    y_is_hard = bool(jnp.issubdtype(y.dtype, jnp.bool_) or jnp.issubdtype(y.dtype, jnp.integer))
    fast_path = (
        (assume_binary_targets or y_is_hard)
        and float(gamma_pos).is_integer() and float(gamma_neg).is_integer()
        and gamma_pos >= 0 and gamma_neg >= 0
    )

    est_vmem = (2 * block_rows * C_pad * (itemsize_x + itemsize_y)   # double-buffered inputs
                + 6 * block_rows * C_pad * 4                         # live f32 temporaries
                + (2 << 20))                                         # acc/out/slack
    vmem_limit = min(max(est_vmem, 32 << 20), (48 << 20) if is_v7x else (100 << 20))

    kernel = functools.partial(
        _asl_kernel,
        gamma_neg=gamma_neg, gamma_pos=gamma_pos, clip=clip, eps=eps,
        blocks_total=blocks_total, blocks_per_par=blocks_per_par,
        block_rows=block_rows, rows_in_last=rows_in_last,
        fast_path=fast_path, needs_row_mask=needs_row_mask,
        has_padded_blocks=has_padded_blocks,
    )

    last_block = blocks_total - 1

    def in_index_map(i, j):
        # Clamp so padding grid blocks (when n_par doesn't divide blocks_total)
        # never index past the array; the kernel skips their accumulation.
        return (jnp.minimum(i * blocks_per_par + j, last_block), 0)

    partials = pl.pallas_call(
        kernel,
        out_shape=jax.ShapeDtypeStruct((n_par * 8, 128), jnp.float32),
        grid_spec=pltpu.PrefetchScalarGridSpec(
            num_scalar_prefetch=0,
            grid=(n_par, blocks_per_par),
            in_specs=[
                # Last dim = full array dim C (no column padding / masking).
                pl.BlockSpec((block_rows, C), in_index_map),
                pl.BlockSpec((block_rows, C), in_index_map),
            ],
            out_specs=pl.BlockSpec((8, 128), lambda i, j: (i, 0)),
            scratch_shapes=[pltpu.VMEM((8, C), jnp.float32)],
        ),
        compiler_params=pltpu.CompilerParams(
            # Leading axis splits across TensorCores (2x on v7x; no-op on v5e/v6e);
            # trailing axis is the sequential reduction over batch tiles.
            dimension_semantics=("parallel", "arbitrary"),
            vmem_limit_bytes=int(vmem_limit),
        ),
    )(x, y)

    # Each core's (8, 128) block holds its replicated partial sum.
    per_core = partials.reshape(n_par, 8, 128)[:, 0, 0]
    return -jnp.sum(per_core) / jnp.float32(B * C)


def asymmetric_loss_ref(x, y, *, gamma_neg=4, gamma_pos=1, clip=0.05, eps=1e-8):
    """Pure-JAX reference, mirrors the torch module exactly."""
    x = x.astype(jnp.float32)
    y = y.astype(jnp.float32)
    x_sigmoid = jax.nn.sigmoid(x)
    xs_pos = x_sigmoid
    xs_neg = 1.0 - x_sigmoid
    if clip is not None and clip > 0:
        xs_neg = jnp.minimum(xs_neg + clip, 1.0)
    los_pos = y * jnp.log(jnp.maximum(xs_pos, eps))
    los_neg = (1.0 - y) * jnp.log(jnp.maximum(xs_neg, eps))
    loss = los_pos + los_neg
    if gamma_neg > 0 or gamma_pos > 0:
        pt = xs_pos * y + xs_neg * (1.0 - y)
        one_sided_gamma = gamma_pos * y + gamma_neg * (1.0 - y)
        loss = loss * jnp.power(1.0 - pt, one_sided_gamma)
    return -jnp.mean(loss)


if __name__ == "__main__":
    key = jax.random.PRNGKey(0)
    keys = jax.random.split(key, 6)

    def check(x, y, rtol=5e-4, **kw):
        out = jax.block_until_ready(asymmetric_loss(x, y, **kw))
        ref = jax.block_until_ready(asymmetric_loss_ref(x, y))
        assert bool(jnp.isfinite(out)), "kernel produced non-finite loss"
        tol = rtol * max(1.0, abs(float(ref)))
        assert abs(float(out) - float(ref)) < tol, (float(out), float(ref), kw)

    # 1) Unaligned (B, C): ragged row block + ragged lane dim; fast and general paths.
    B, C = 12, 200
    x = jax.random.normal(keys[0], (B, C), dtype=jnp.float32) * 3.0
    y = (jax.random.uniform(keys[1], (B, C)) < 0.3).astype(jnp.float32)
    check(x, y, assume_binary_targets=True)   # fused-log fast path
    check(x, y)                               # safe default -> general (jnp.power) path

    # 2) Aligned shapes, both paths.
    B2, C2 = 16, 256
    x2 = jax.random.normal(keys[2], (B2, C2), dtype=jnp.float32) * 3.0
    y2 = (jax.random.uniform(keys[3], (B2, C2)) < 0.3).astype(jnp.float32)
    check(x2, y2, assume_binary_targets=True)
    check(x2, y2, assume_binary_targets=False)

    # 3) Multi-block + forced 2-way core split + ragged last block + padded grid blocks;
    #    integer targets auto-enable the fast path.
    B3, C3 = 36, 136
    x3 = jax.random.normal(keys[4], (B3, C3), dtype=jnp.float32) * 3.0
    y3 = (jax.random.uniform(keys[5], (B3, C3)) < 0.3).astype(jnp.int32)
    check(x3, y3, num_parallel=2, block_rows=8)

    # 4) bf16 logits (16-row sublane tiles), binary f32 targets.
    x4 = x2.astype(jnp.bfloat16)
    check(x4, y2, assume_binary_targets=True, rtol=1e-3)

    print("KERNEL_OK")
</pallas_src>

<mosaic_0001>
module attributes {stable_mosaic.version = 11 : i64} {
  func.func @_asl_kernel(%arg0: i32, %arg1: i32, %arg2: memref<16x200xf32, #tpu.memory_space<vmem>>, %arg3: memref<16x200xf32, #tpu.memory_space<vmem>>, %arg4: memref<8x128xf32, #tpu.memory_space<vmem>>, %arg5: memref<8x200xf32, #tpu.memory_space<vmem>>) attributes {dimension_semantics = [#tpu.dimension_semantics<parallel>, #tpu.dimension_semantics<arbitrary>], iteration_bounds = array<i64: 1, 1>, scalar_prefetch = 0 : i64, scratch_operands = 1 : i64, tpu.core_type = #tpu.core_type<tc>, window_params = [{transform_indices = @transform_0, window_bounds = array<i64: 16, 200>}, {transform_indices = @transform_1, window_bounds = array<i64: 16, 200>}, {transform_indices = @transform_2, window_bounds = array<i64: 8, 128>}]} {
    %c0_i32 = arith.constant 0 : i32
    %0 = arith.cmpi eq, %arg1, %c0_i32 : i32
    %1 = arith.extui %0 : i1 to i32
    %c0_i32_0 = arith.constant 0 : i32
    %2 = arith.cmpi ne, %1, %c0_i32_0 : i32
    scf.if %2 {
      %cst_20 = arith.constant 0.000000e+00 : f32
      %47 = vector.broadcast %cst_20 : f32 to vector<8x200xf32>
      %c0_21 = arith.constant 0 : index
      %c0_22 = arith.constant 0 : index
      %48 = vector.load %arg5[%c0_21, %c0_22] : memref<8x200xf32, #tpu.memory_space<vmem>>, vector<8x200xf32>
      tpu.vector_store %arg5[%c0_21, %c0_22], %47 {strides = array<i32>} : memref<8x200xf32, #tpu.memory_space<vmem>>, vector<8x200xf32>,
    } else {
    }
    %c0 = arith.constant 0 : index
    %c0_1 = arith.constant 0 : index
    %3 = vector.load %arg2[%c0, %c0_1] : memref<16x200xf32, #tpu.memory_space<vmem>>, vector<16x200xf32>
    %c0_2 = arith.constant 0 : index
    %c0_3 = arith.constant 0 : index
    %4 = vector.load %arg3[%c0_2, %c0_3] : memref<16x200xf32, #tpu.memory_space<vmem>>, vector<16x200xf32>
    %cst = arith.constant 5.000000e-01 : f32
    %5 = vector.broadcast %cst : f32 to vector<16x200xf32>
    %6 = arith.mulf %3, %5 : vector<16x200xf32>
    %7 = math.tanh %6 : vector<16x200xf32>
    %cst_4 = arith.constant 5.000000e-01 : f32
    %8 = vector.broadcast %cst_4 : f32 to vector<16x200xf32>
    %9 = arith.mulf %8, %7 : vector<16x200xf32>
    %cst_5 = arith.constant 5.000000e-01 : f32
    %10 = vector.broadcast %cst_5 : f32 to vector<16x200xf32>
    %11 = arith.addf %9, %10 : vector<16x200xf32>
    %cst_6 = arith.constant 5.000000e-01 : f32
    %12 = vector.broadcast %cst_6 : f32 to vector<16x200xf32>
    %13 = arith.mulf %12, %7 : vector<16x200xf32>
    %cst_7 = arith.constant 5.000000e-01 : f32
    %14 = vector.broadcast %cst_7 : f32 to vector<16x200xf32>
    %15 = arith.subf %14, %13 : vector<16x200xf32>
    %cst_8 = arith.constant 5.000000e-02 : f32
    %16 = vector.broadcast %cst_8 : f32 to vector<16x200xf32>
    %17 = arith.addf %15, %16 : vector<16x200xf32>
    %cst_9 = arith.constant 1.000000e+00 : f32
    %18 = vector.broadcast %cst_9 : f32 to vector<16x200xf32>
    %19 = arith.minimumf %17, %18 : vector<16x200xf32>
    %20 = arith.mulf %11, %4 : vector<16x200xf32>
    %cst_10 = arith.constant 1.000000e+00 : f32
    %21 = vector.broadcast %cst_10 : f32 to vector<16x200xf32>
    %22 = arith.subf %21, %4 : vector<16x200xf32>
    %23 = arith.mulf %19, %22 : vector<16x200xf32>
    %24 = arith.addf %20, %23 : vector<16x200xf32>
    %cst_11 = arith.constant 9.99999993E-9 : f32
    %25 = vector.broadcast %cst_11 : f32 to vector<16x200xf32>
    %26 = arith.maximumf %24, %25 : vector<16x200xf32>
    %27 = math.log %26 : vector<16x200xf32>
    %cst_12 = arith.constant 1.000000e+00 : f32
    %28 = vector.broadcast %cst_12 : f32 to vector<16x200xf32>
    %29 = arith.subf %28, %24 : vector<16x200xf32>
    %30 = arith.mulf %29, %29 : vector<16x200xf32>
    %31 = arith.mulf %30, %30 : vector<16x200xf32>
    %cst_13 = arith.constant 5.000000e-01 : f32
    %32 = vector.broadcast %cst_13 : f32 to vector<16x200xf32>
    %33 = arith.cmpf ogt, %4, %32 : vector<16x200xf32>
    %34 = arith.select %33, %29, %31 : vector<16x200xi1>, vector<16x200xf32>
    %35 = arith.mulf %27, %34 : vector<16x200xf32>
    %c1_i32 = arith.constant 1 : i32
    %36 = arith.muli %arg0, %c1_i32 : i32
    %37 = arith.addi %36, %arg1 : i32
    %c0_i32_14 = arith.constant 0 : i32
    %38 = arith.cmpi slt, %37, %c0_i32_14 : i32
    %39 = arith.extui %38 : i1 to i32
    %c0_i32_15 = arith.constant 0 : i32
    %40 = arith.cmpi ne, %39, %c0_i32_15 : i32
    scf.if %40 {
      %c0_20 = arith.constant 0 : index
      %c0_21 = arith.constant 0 : index
      %47 = vector.load %arg5[%c0_20, %c0_21] : memref<8x200xf32, #tpu.memory_space<vmem>>, vector<8x200xf32>
      %48 = vector.shape_cast %35 : vector<16x200xf32> to vector<2x8x200xf32>
      %cst_22 = arith.constant dense<0.000000e+00> : vector<8x200xf32>
      %49 = vector.multi_reduction <add>, %48, %cst_22 [0] : vector<2x8x200xf32> to vector<8x200xf32>
      %50 = arith.addf %47, %49 : vector<8x200xf32>
      %c0_23 = arith.constant 0 : index
      %c0_24 = arith.constant 0 : index
      %51 = vector.load %arg5[%c0_23, %c0_24] : memref<8x200xf32, #tpu.memory_space<vmem>>, vector<8x200xf32>
      tpu.vector_store %arg5[%c0_23, %c0_24], %50 {strides = array<i32>} : memref<8x200xf32, #tpu.memory_space<vmem>>, vector<8x200xf32>,
    } else {
    }
    %c0_i32_16 = arith.constant 0 : i32
    %41 = arith.cmpi eq, %37, %c0_i32_16 : i32
    %42 = arith.extui %41 : i1 to i32
    %c0_i32_17 = arith.constant 0 : i32
    %43 = arith.cmpi ne, %42, %c0_i32_17 : i32
    scf.if %43 {
      %47 = tpu.iota {dimensions = array<i32: 0>} : vector<16x200xi32>
      %c0_20 = arith.constant 0 : index
      %c0_21 = arith.constant 0 : index
      %48 = vector.load %arg5[%c0_20, %c0_21] : memref<8x200xf32, #tpu.memory_space<vmem>>, vector<8x200xf32>
      %c12_i32 = arith.constant 12 : i32
      %49 = vector.broadcast %c12_i32 : i32 to vector<16x200xi32>
      %50 = arith.cmpi slt, %47, %49 : vector<16x200xi32>
      %cst_22 = arith.constant 0.000000e+00 : f32
      %51 = vector.broadcast %cst_22 : f32 to vector<16x200xf32>
      %52 = arith.select %50, %35, %51 : vector<16x200xi1>, vector<16x200xf32>
      %53 = vector.shape_cast %52 : vector<16x200xf32> to vector<2x8x200xf32>
      %cst_23 = arith.constant dense<0.000000e+00> : vector<8x200xf32>
      %54 = vector.multi_reduction <add>, %53, %cst_23 [0] : vector<2x8x200xf32> to vector<8x200xf32>
      %55 = arith.addf %48, %54 : vector<8x200xf32>
      %c0_24 = arith.constant 0 : index
      %c0_25 = arith.constant 0 : index
      %56 = vector.load %arg5[%c0_24, %c0_25] : memref<8x200xf32, #tpu.memory_space<vmem>>, vector<8x200xf32>
      tpu.vector_store %arg5[%c0_24, %c0_25], %55 {strides = array<i32>} : memref<8x200xf32, #tpu.memory_space<vmem>>, vector<8x200xf32>,
    } else {
    }
    %c0_i32_18 = arith.constant 0 : i32
    %44 = arith.cmpi eq, %arg1, %c0_i32_18 : i32
    %45 = arith.extui %44 : i1 to i32
    %c0_i32_19 = arith.constant 0 : i32
    %46 = arith.cmpi ne, %45, %c0_i32_19 : i32
    scf.if %46 {
      %c0_20 = arith.constant 0 : index
      %c0_21 = arith.constant 0 : index
      %47 = vector.load %arg5[%c0_20, %c0_21] : memref<8x200xf32, #tpu.memory_space<vmem>>, vector<8x200xf32>
      %48 = vector.shape_cast %47 : vector<8x200xf32> to vector<1x8x200xf32>
      %cst_22 = arith.constant dense<0.000000e+00> : vector<1xf32>
      %49 = vector.multi_reduction <add>, %48, %cst_22 [1, 2] : vector<1x8x200xf32> to vector<1xf32>
      %50 = vector.shape_cast %49 : vector<1xf32> to vector<1x1x1xf32>
      %51 = vector.extract %50[0, 0, 0] : f32 from vector<1x1x1xf32>
      %52 = vector.broadcast %51 : f32 to vector<8x128xf32>
      %c0_23 = arith.constant 0 : index
      %c0_24 = arith.constant 0 : index
      %53 = vector.load %arg4[%c0_23, %c0_24] : memref<8x128xf32, #tpu.memory_space<vmem>>, vector<8x128xf32>
      tpu.vector_store %arg4[%c0_23, %c0_24], %52 {strides = array<i32>} : memref<8x128xf32, #tpu.memory_space<vmem>>, vector<8x128xf32>,
    } else {
    }
    return
  }
  func.func @transform_0(%arg0: i32, %arg1: i32) -> (i32, i32) {
    %c1_i32 = arith.constant 1 : i32
    %0 = arith.muli %arg0, %c1_i32 : i32
    %1 = arith.addi %0, %arg1 : i32
    %c0_i32 = arith.constant 0 : i32
    %2 = arith.minsi %1, %c0_i32 : i32
    %c0_i32_0 = arith.constant 0 : i32
    %c0_i32_1 = arith.constant 0 : i32
    return %2, %c0_i32_0 : i32, i32
  }
  func.func @transform_1(%arg0: i32, %arg1: i32) -> (i32, i32) {
    %c1_i32 = arith.constant 1 : i32
    %0 = arith.muli %arg0, %c1_i32 : i32
    %1 = arith.addi %0, %arg1 : i32
    %c0_i32 = arith.constant 0 : i32
    %2 = arith.minsi %1, %c0_i32 : i32
    %c0_i32_0 = arith.constant 0 : i32
    %c0_i32_1 = arith.constant 0 : i32
    return %2, %c0_i32_0 : i32, i32
  }
  func.func @transform_2(%arg0: i32, %arg1: i32) -> (i32, i32) {
    %c0_i32 = arith.constant 0 : i32
    %c0_i32_0 = arith.constant 0 : i32
    return %arg0, %c0_i32 : i32, i32
  }
}

</mosaic_0001>

<bundles_post_ra>
// kernel: tpu_custom_call.1
= control target key start
LH: loop header
LB: loop body
LE: loop exit
PB: predicated region body
PF: predicated region fallthrough
CT: control target
= control target key end

     0   :  { %7 = vsyncpa [#allocation4], 0  ;;  %s381_s0 = inlined_call_operand.hbm [shape: f32[12,200], index: 0, kind: input, shape index: {}]   ;;  %s382_s1 = inlined_call_operand.hbm [shape: f32[12,200], index: 1, kind: input, shape index: {}]   ;;  %s383_s2 = inlined_call_operand.hbm [shape: f32[8,128], index: 2, kind: output, shape index: {}]  }
   0x1   :  { %8 = vsyncpa [#allocation7], 0 }
   0x2   :  { %9 = vsyncpa [#allocation5], 0  ;;  %s326_s9 = smov [#allocation3]  }
   0x3   :  { %s22_s10 = sshll.u32 %s326_s9, 4  ;;  %s23_s10 = int_to_ptr.vmem [resolvable:$true] %s22_s10 }
   0x4   :  { %s268_s11 = scalar_lea.vmem %s23_s10, 512  ;;  %p273_p1 = scmp.lt.s32.totalorder %s23_s10, %s23_s10 }
   0x5   :  { %p269_p0 = scmp.ne.s32.totalorder %s23_s10, %s268_s11  ;;  %p274_p2 = scmp.lt.s32.totalorder %s268_s11, %s268_s11 }
   0x7   :  { %p275_p3 = por %p274_p2, %p273_p1 }
   0x9   :  { %p276_p4 = pnand %p275_p3, %p269_p0 }
   0xb   :  { %279 = shalt.err (!%p276_p4)
}
   0xc   :  { %s327_s12 = smov 256   ;;  %s328_s13 = smov 16  }
   0xd   :  { %28 = dma.hbm_to_vmem [thread:$0]  %s381_s0, 512, %s23_s10, [#allocation4], %s327_s12, %s327_s12, %s328_s13  }
   0xe   :  { %s329_s16 = smov [#allocation6]  }
   0xf   :  { %s41_s17 = sshll.u32 %s329_s16, 4  ;;  %s42_s17 = int_to_ptr.vmem [resolvable:$true] %s41_s17 }
  0x10   :  { %s288_s18 = scalar_lea.vmem %s42_s17, 512  ;;  %p293_p6 = scmp.lt.s32.totalorder %s42_s17, %s42_s17 }
  0x11   :  { %p289_p5 = scmp.ne.s32.totalorder %s42_s17, %s288_s18  ;;  %p294_p7 = scmp.lt.s32.totalorder %s288_s18, %s288_s18 }
  0x13   :  { %p295_p8 = por %p294_p7, %p293_p6 }
  0x15   :  { %p296_p9 = pnand %p295_p8, %p289_p5 }
  0x17   :  { %299 = shalt.err (!%p296_p9)
}
  0x18   :  { %47 = dma.hbm_to_vmem [thread:$0]  %s382_s1, 512, %s42_s17, [#allocation7], %s327_s12, %s327_s12, %s328_s13  }
  0x19   :  { %320 = dma.done.wait [#allocation4], 512  }
  0x1a   :  { %321 = vsyncadd [#allocation4], 4294966784 }
  0x1b   :  { %322 = dma.done.wait [#allocation7], 512  }
  0x1c   :  { %323 = vsyncadd [#allocation7], 4294966784  ;;  %vm67_vm0 = vcmask 588800   ;;  %v330_v0 = vmov 0.0   ;;  %v69_v1 = vld [vmem:[#allocation3] sm:$0xff]  ;;  %v70_v2 = vld [vmem:[#allocation3 + $0x8] sm:$0xff]  ;;  %v177_v63 = vlaneseq }
  0x1d   :  { %68 = vst.msk [vmem:[#allocation2 + $0x8] sm:$0xff] %vm67_vm0, %v330_v0  ;;  %v71_v3 = vld [vmem:[#allocation3 + $0x10] sm:$0xff]  ;;  %v72_v4 = vld [vmem:[#allocation3 + $0x18] sm:$0xff]  ;;  %v77_v5 = vmul.f32 0.5, %v69_v1  ;;  %v78_v6 = vmul.f32 0.5, %v70_v2  ;;  %v354_v13 = vld [vmem:[#allocation6] sm:$0xff] }
  0x1e   :  { %v79_v7 = vmul.f32 0.5, %v71_v3  ;;  %v80_v8 = vmul.f32 0.5, %v72_v4  ;;  %v356_v16 = vld [vmem:[#allocation6 + $0x8] sm:$0xff]  ;;  %v358_v20 = vld [vmem:[#allocation6 + $0x10] sm:$0xff]  ;;  %v360_v24 = vld [vmem:[#allocation6 + $0x18] sm:$0xff]  ;;  %v109_v28 = vsub.f32 1.0, %v354_v13 }
  0x1f   :  { %244 = vtanh.f32 %v77_v5  ;;  %v110_v32 = vsub.f32 1.0, %v356_v16  ;;  %v111_v36 = vsub.f32 1.0, %v358_v20  ;;  %v112_v40 = vsub.f32 1.0, %v360_v24  ;;  %s331_s0 = smov [#allocation8]  }
  0x20   :  { %246 = vtanh.f32 %v78_v6  ;;  %v178_v4 = vshrl.u32 %v177_v63, 7  ;;  %vm145_vm1 = vcmp.gt.f32.partialorder %v354_v13, 0.5  ;;  %vm146_vm2 = vcmp.gt.f32.partialorder %v356_v16, 0.5  ;;  %s222_s1 = sshll.u32 %s331_s0, 4  ;;  %s223_s1 = int_to_ptr.vmem [resolvable:$true] %s222_s1 }
  0x21   :  { %248 = vtanh.f32 %v79_v7  ;;  %vm147_vm3 = vcmp.gt.f32.partialorder %v358_v20, 0.5  ;;  %vm148_vm4 = vcmp.gt.f32.partialorder %v360_v24, 0.5  ;;  %s300_s22 = scalar_lea.vmem %s223_s1, 128  ;;  %p305_p11 = scmp.lt.s32.totalorder %s223_s1, %s223_s1 }
  0x22   :  { %250 = vtanh.f32 %v80_v8  ;;  %p301_p10 = scmp.ne.s32.totalorder %s223_s1, %s300_s22  ;;  %p306_p12 = scmp.lt.s32.totalorder %s300_s22, %s300_s22 }
  0x24   :  { %p307_p13 = por %p306_p12, %p305_p11 }
  0x26   :  { %p308_p0 = pnand %p307_p13, %p301_p10 }
  0x2c   :  { %v245_v9 = vpop.eup %244 }
  0x2d   :  { %v247_v10 = vpop.eup %246  ;;  %v85_v11 = vmul.f32 0.5, %v245_v9 }
  0x2e   :  { %v249_v12 = vpop.eup %248  ;;  %v86_v14 = vmul.f32 0.5, %v247_v10 }
  0x2f   :  { %v251_v15 = vpop.eup %250  ;;  %v87_v17 = vmul.f32 0.5, %v249_v12  ;;  %v89_v18 = vadd.f32 0.5, %v85_v11  ;;  %v93_v19 = vsub.f32 0.5, %v85_v11  ;;  %v179_v12 = vadd.s32 8, %v178_v4 }
  0x30   :  { %v88_v21 = vmul.f32 0.5, %v251_v15  ;;  %v90_v22 = vadd.f32 0.5, %v86_v14  ;;  %v94_v23 = vsub.f32 0.5, %v86_v14 }
  0x31   :  { %v91_v25 = vadd.f32 0.5, %v87_v17  ;;  %v95_v26 = vsub.f32 0.5, %v87_v17  ;;  %v97_v27 = vadd.f32 0.05, %v93_v19  ;;  %v105_v35 = vmul.f32 %v89_v18, %v354_v13 }
  0x32   :  { %v92_v29 = vadd.f32 0.5, %v88_v21  ;;  %v96_v30 = vsub.f32 0.5, %v88_v21  ;;  %v98_v31 = vadd.f32 0.05, %v94_v23  ;;  %v106_v39 = vmul.f32 %v90_v22, %v356_v16 }
  0x33   :  { %v99_v33 = vadd.f32 0.05, %v95_v26  ;;  %v101_v34 = vmin.f32 %v97_v27, 1.0  ;;  %v107_v42 = vmul.f32 %v91_v25, %v358_v20  ;;  %vm183_vm5 = vcmp.lt.s32.totalorder %v179_v12, 12 }
  0x34   :  { %v100_v37 = vadd.f32 0.05, %v96_v30  ;;  %v102_v38 = vmin.f32 %v98_v31, 1.0  ;;  %v108_v45 = vmul.f32 %v92_v29, %v360_v24 }
  0x35   :  { %v103_v41 = vmin.f32 %v99_v33, 1.0  ;;  %v113_v43 = vmul.f32 %v109_v28, %v101_v34  ;;  %v181_v28 = vld [vmem:[#allocation2 + $0x8] sm:$0xff] }
  0x36   :  { %v104_v44 = vmin.f32 %v100_v37, 1.0  ;;  %v114_v46 = vmul.f32 %v110_v32, %v102_v38 }
  0x37   :  { %v115_v47 = vmul.f32 %v111_v36, %v103_v41  ;;  %v117_v48 = vadd.f32 %v113_v43, %v105_v35 }
  0x38   :  { %v116_v49 = vmul.f32 %v112_v40, %v104_v44  ;;  %v118_v50 = vadd.f32 %v114_v46, %v106_v39 }
  0x39   :  { %v119_v51 = vadd.f32 %v115_v47, %v107_v42  ;;  %v121_v52 = vmax.f32 %v117_v48, 1e-08  ;;  %v133_v57 = vsub.f32 1.0, %v117_v48 }
  0x3a   :  { %v120_v53 = vadd.f32 %v116_v49, %v108_v45  ;;  %v122_v54 = vmax.f32 %v118_v50, 1e-08  ;;  %v134_v58 = vsub.f32 1.0, %v118_v50 }
  0x3b   :  { %v123_v55 = vmax.f32 %v119_v51, 1e-08  ;;  %252 = vlog2.f32 %v121_v52  ;;  %v135_v59 = vsub.f32 1.0, %v119_v51  ;;  %v137_v61 = vmul.f32 %v133_v57, %v133_v57 }
  0x3c   :  { %v124_v56 = vmax.f32 %v120_v53, 1e-08  ;;  %254 = vlog2.f32 %v122_v54  ;;  %v136_v60 = vsub.f32 1.0, %v120_v53  ;;  %v138_v62 = vmul.f32 %v134_v58, %v134_v58 }
  0x3d   :  { %256 = vlog2.f32 %v123_v55  ;;  %v139_v0 = vmul.f32 %v135_v59, %v135_v59  ;;  %v141_v2 = vmul.f32 %v137_v61, %v137_v61 }
  0x3e   :  { %258 = vlog2.f32 %v124_v56  ;;  %v140_v1 = vmul.f32 %v136_v60, %v136_v60  ;;  %v142_v3 = vmul.f32 %v138_v62, %v138_v62 }
  0x3f   :  { %v143_v5 = vmul.f32 %v139_v0, %v139_v0  ;;  %v149_v10 = vsel %vm145_vm1, %v133_v57, %v141_v2 }
  0x40   :  { %v144_v6 = vmul.f32 %v140_v1, %v140_v1  ;;  %v150_v11 = vsel %vm146_vm2, %v134_v58, %v142_v3 }
  0x41   :  { %v151_v17 = vsel %vm147_vm3, %v135_v59, %v143_v5 }
  0x42   :  { %v152_v21 = vsel %vm148_vm4, %v136_v60, %v144_v6 }
  0x48   :  { %v253_v7 = vpop.eup %252 }
  0x49   :  { %v255_v8 = vpop.eup %254  ;;  %v126_v9 = vmul.f32 0.6931472, %v253_v7 }
  0x4a   :  { %v257_v14 = vpop.eup %256  ;;  %v128_v15 = vmul.f32 0.6931472, %v255_v8 }
  0x4b   :  { %v259_v18 = vpop.eup %258  ;;  %v130_v19 = vmul.f32 0.6931472, %v257_v14  ;;  %v153_v22 = vmul.f32 %v149_v10, %v126_v9 }
  0x4c   :  { %v132_v13 = vmul.f32 0.6931472, %v259_v18  ;;  %v154_v16 = vmul.f32 %v150_v11, %v128_v15 }
  0x4d   :  { %v155_v23 = vmul.f32 %v151_v17, %v130_v19 }
  0x4e   :  { %v156_v20 = vmul.f32 %v152_v21, %v132_v13  ;;  %v190_v24 = vsel %vm67_vm0, %v154_v16, 0.0 }
  0x4f   :  { %v186_v25 = vsel %vm183_vm5, %v155_v23, 0.0 }
  0x50   :  { %v187_v26 = vsel %vm183_vm5, %v156_v20, 0.0  ;;  %v188_v27 = vadd.f32 %v186_v25, %v153_v22 }
  0x51   :  { %v191_v29 = vsel %vm67_vm0, %v187_v26, 0.0 }
  0x52   :  { %v192_v30 = vadd.f32 %v191_v29, %v190_v24 }
  0x54   :  { %v194_v31 = vadd.f32 %v192_v30, %v181_v28 }
  0x56   :  { %196 = vst.msk [vmem:[#allocation2 + $0x8] sm:$0xff] %vm67_vm0, %v194_v31 }
  0x5d   :  { %v201_v32 = vld [vmem:[#allocation2 + $0x8] sm:$0xff] }
  0x5e   :  { %v203_v33 = vsel %vm67_vm0, %v201_v32, 0.0 }
  0x5f   :  { %v204_v34 = vadd.f32 %v203_v33, %v188_v27 }
  0x61   :  { %205 = vadd.xlane.f32.xlu0 %v204_v34 }
  0xea   :  { %v206_v35 = vpop.xlane.xlu0 %205 }
  0xeb   :  { %v207_v36 = vrot.slane %v206_v35, 4 }
  0xed   :  { %v208_v37 = vadd.f32 %v207_v36, %v206_v35 }
  0xef   :  { %v209_v38 = vrot.slane %v208_v37, 2 }
  0xf1   :  { %v210_v39 = vadd.f32 %v209_v38, %v208_v37 }
  0xf3   :  { %v211_v40 = vrot.slane %v210_v39, 1 }
  0xf5   :  { %v212_v41 = vadd.f32 %v211_v40, %v210_v39 }
  0xf7   :  { %236 = vpush %v212_v41 }
 0x128   :  { %s237_s21 = spop %236 }
 0x129   :  { %v214_v42 = vstv %s237_s21 }
 0x12a   :  { %215 = vst [vmem:[#allocation8] sm:$0xff] %v214_v42 }
 0x12b   :  { %311 = shalt.err (!%p308_p0)
}
 0x12c   :  { %225 = dma.vmem_to_hbm [thread:$0]  %s223_s1, 128, %s383_s2, [#allocation5]  }
 0x12d   :  { %324 = dma.done.wait [#allocation5], 128  }
 0x12e   :  { %325 = vsyncadd [#allocation5], 4294967168 }
 0x12f   :  { %229 = vsyncpa [#allocation4], 1 }
 0x130   :  { %230 = vsyncpa [#allocation7], 1 }
 0x131   :  { %231 = vsyncpa [#allocation5], 1 }

</bundles_post_ra>
